<compile_context>
chip_gen: v7x
topology: tpu7x:2x2x1
jax: 0.10.0
libtpu: 0.0.40
codegen_flags: <defaults>
</compile_context>

<pallas_src>
import jax
import jax.numpy as jnp
from jax import lax
from jax.experimental import pallas as pl
from jax.experimental.pallas import tpu as pltpu

EPS_BN = 1e-5
EPS_LAP = 1e-5


# ---------------------------------------------------------------------------
# Kernel 1: dense edge prediction -> predicted (normalized, symmetrized) adjacency
# grid = (B,), marked "parallel" (independent per sample; 2x on v7x's 2 TCs).
# ---------------------------------------------------------------------------
def edge_adj_kernel(x_ref, mcol_ref, mrow_ref, w1_ref, b1_ref, w2_ref, b2_ref,
                    out_ref):
    # x:(1,N,C)  mcol:(1,N,1)  mrow:(1,1,N)  w1:(2C,H)  b1:(1,H)  w2:(1,H)
    # b2:(1,1)   out:(1,N,N)
    x = x_ref[0]                                   # (N, C)
    m_col = mcol_ref[0]                            # (N, 1)
    m_row = mrow_ref[0]                            # (1, N)
    n, c = x.shape
    w1 = w1_ref[...]                               # (2C, H)
    b1 = b1_ref[...]                               # (1, H)
    w2 = w2_ref[...]                               # (1, H)

    # First pair-MLP layer is separable before the ReLU.
    ua = jnp.dot(x, w1[:c, :], preferred_element_type=jnp.float32)   # (N, H)
    ub = jnp.dot(x, w1[c:, :], preferred_element_type=jnp.float32)   # (N, H)

    # Vectorized pair MLP (no per-column loop, no (N,1) concats):
    #   G[i,j] = w2 . relu(ua[i] + ub[j] + b1)
    h3 = jnp.maximum(ua[:, None, :] + ub[None, :, :] + b1[None, :, :], 0.0)  # (N,N,H)
    g = jnp.sum(h3 * w2[None, :, :], axis=-1)      # (N, N)  (== einsum 'ijh,h->ij')

    # f(x_i||x_j) + f(x_j||x_i) = G[i,j] + G[j,i] + 2*b2  (symmetric)
    s_sum = g + g.T + 2.0 * b2_ref[...]            # (N, N)

    ii = lax.broadcasted_iota(jnp.int32, (n, n), 0)
    jj = lax.broadcasted_iota(jnp.int32, (n, n), 1)
    valid = (ii < jj) & ((m_col * m_row) > 0.5)    # strict upper triangle & both masked

    # Mask BEFORE the exp so masked pairs can never produce inf*0 = NaN;
    # exp(-1e30) underflows to exactly 0, matching the PyTorch scatter of only
    # valid pairs into a zero matrix.
    a_pred = jnp.exp(jnp.where(valid, 0.5 * s_sum, -1e30))            # (N, N)

    row_sum = jnp.sum(a_pred, axis=1, keepdims=True)                  # (N, 1)
    row_sum = jnp.where(row_sum == 0.0, 1.0, row_sum)                 # zero rows -> /1
    a_norm = a_pred / row_sum
    out_ref[0] = a_norm + a_norm.T                 # symmetrize


# ---------------------------------------------------------------------------
# Kernel 2: fused 3x GraphConv (2 relations, K=1) + mask + BatchNorm + ReLU,
#           then readout (max over nodes, Linear -> Linear).
# Whole batch in one block: BatchNorm statistics are cross-batch, and at these
# sizes everything fits trivially in VMEM.  Laplacians are computed once and
# stay resident across the three layers.
# TODO(synk): at realistic B*N^2 add a batch grid (sized for v7x's 64 MiB VMEM,
#             marked "parallel") and a two-pass / reduction-axis BatchNorm.
# ---------------------------------------------------------------------------
def fused_gcn_kernel(x_ref, a0_ref, a1_ref, mask_ref,
                     w1_ref, b1_ref, g1_ref, be1_ref,
                     w2_ref, b2_ref, g2_ref, be2_ref,
                     w3_ref, b3_ref, g3_ref, be3_ref,
                     fw1_ref, fb1_ref, fw2_ref, fb2_ref,
                     out_ref):
    # x:(B,N,Cin) a0,a1:(B,N,N) mask:(B,N,1) w*: (2Cin,Cout) b*/g*/be*:(1,Cout)
    # fw1:(F,H) fb1:(1,H) fw2:(H,O) fb2:(1,O) out:(B,O)
    x = x_ref[...]
    bsz, n, _ = x.shape
    mask_flat = mask_ref[...].reshape(bsz * n, 1)

    ii = lax.broadcasted_iota(jnp.int32, (n, n), 0)
    jj = lax.broadcasted_iota(jnp.int32, (n, n), 1)
    eye = (ii == jj).astype(jnp.float32)

    def laplacian(a):                               # a: (B, N, N)
        a_hat = a + eye[None, :, :]                 # K == 1  ->  A + I
        # Elementwise row/col scaling (no diagonal-matrix matmuls).
        # PyTorch uses the axis=1 (column) degree for BOTH sides; row and column
        # degrees coincide here because A_hat is symmetric (A_orig is symmetric
        # and A_pred is symmetrized), so no transpose is needed.
        d_row = lax.rsqrt(jnp.sum(a_hat, axis=2, keepdims=True) + EPS_LAP)  # (B,N,1)
        d_col = lax.rsqrt(jnp.sum(a_hat, axis=1, keepdims=True) + EPS_LAP)  # (B,1,N)
        return a_hat * d_row * d_col

    lap0 = laplacian(a0_ref[...])                   # computed once, reused by all layers
    lap1 = laplacian(a1_ref[...])

    h = x
    for w_ref, b_ref, g_ref, be_ref in (
            (w1_ref, b1_ref, g1_ref, be1_ref),
            (w2_ref, b2_ref, g2_ref, be2_ref),
            (w3_ref, b3_ref, g3_ref, be3_ref)):
        cin = h.shape[2]
        w = w_ref[...]                              # (2*Cin, Cout)
        cout = w.shape[1]

        # TODO(synk): at scale, cast lap/h (and the fc operands) to bf16 with f32
        # accumulation for the v6e/v7x MXU fast path (elementwise math stays f32,
        # mandatory on v5e); kept f32 here for exact parity with the reference.
        p0 = jnp.einsum('bij,bjc->bic', lap0, h,
                        preferred_element_type=jnp.float32)          # (B,N,Cin)
        p1 = jnp.einsum('bij,bjc->bic', lap1, h,
                        preferred_element_type=jnp.float32)          # (B,N,Cin)

        # concat([L0 x, L1 x]) @ W  ==  (L0 x) @ W[:Cin] + (L1 x) @ W[Cin:]
        flat = (jnp.dot(p0.reshape(bsz * n, cin), w[:cin, :],
                        preferred_element_type=jnp.float32)
                + jnp.dot(p1.reshape(bsz * n, cin), w[cin:, :],
                          preferred_element_type=jnp.float32)
                + b_ref[...])                                        # (B*N, Cout)
        flat = flat * mask_flat

        # BatchNorm1d, training-mode batch statistics over all (B*N) rows
        # (including masked/zero rows, as in the PyTorch reference), biased var.
        mean = jnp.mean(flat, axis=0, keepdims=True)
        var = jnp.mean((flat - mean) ** 2, axis=0, keepdims=True)
        act = jnp.maximum((flat - mean) * lax.rsqrt(var + EPS_BN) * g_ref[...]
                          + be_ref[...], 0.0)                        # ReLU
        h = act.reshape(bsz, n, cout)

    # Readout fused in (no extra launch / HBM round trip of the activation).
    pooled = jnp.max(h, axis=1)                                      # (B, F)
    hid = jnp.dot(pooled, fw1_ref[...],
                  preferred_element_type=jnp.float32) + fb1_ref[...]
    out_ref[...] = jnp.dot(hid, fw2_ref[...],
                           preferred_element_type=jnp.float32) + fb2_ref[...]


# ---------------------------------------------------------------------------
# Wrappers (glue)
# ---------------------------------------------------------------------------
def predict_adjacency(x, mask, edge_w1, edge_b1, edge_w2, edge_b2):
    B, N, C = x.shape
    H = edge_w1.shape[1]
    mcol = mask.reshape(B, N, 1)
    mrow = mask.reshape(B, 1, N)
    return pl.pallas_call(
        edge_adj_kernel,
        out_shape=jax.ShapeDtypeStruct((B, N, N), jnp.float32),
        grid=(B,),
        in_specs=[
            pl.BlockSpec((1, N, C), lambda b: (b, 0, 0)),
            pl.BlockSpec((1, N, 1), lambda b: (b, 0, 0)),
            pl.BlockSpec((1, 1, N), lambda b: (b, 0, 0)),
            pl.BlockSpec((2 * C, H), lambda b: (0, 0)),
            pl.BlockSpec((1, H), lambda b: (0, 0)),
            pl.BlockSpec((1, H), lambda b: (0, 0)),
            pl.BlockSpec((1, 1), lambda b: (0, 0)),
        ],
        out_specs=pl.BlockSpec((1, N, N), lambda b: (b, 0, 0)),
        compiler_params=pltpu.CompilerParams(dimension_semantics=("parallel",)),
    )(x, mcol, mrow, edge_w1, edge_b1, edge_w2, edge_b2)


def fused_gcn_readout(x, a0, a1, mask3, gconv_params, fc1_w, fc1_b, fc2_w, fc2_b):
    B, _, _ = x.shape
    O = fc2_w.shape[1]
    vmem = pl.BlockSpec(memory_space=pltpu.MemorySpace.VMEM)
    flat_params = []
    for (w, b, gamma, beta) in gconv_params:        # exactly 3 layers
        flat_params += [w, b, gamma, beta]
    n_in = 4 + len(flat_params) + 4
    return pl.pallas_call(
        fused_gcn_kernel,
        out_shape=jax.ShapeDtypeStruct((B, O), jnp.float32),
        in_specs=[vmem] * n_in,
        out_specs=vmem,
    )(x, a0, a1, mask3, *flat_params, fc1_w, fc1_b, fc2_w, fc2_b)


def multicheb_forward(x, a_orig, mask, params):
    B, N, _ = x.shape
    a_pred_new = predict_adjacency(x, mask, params['edge_w1'], params['edge_b1'],
                                   params['edge_w2'], params['edge_b2'])
    mask3 = mask.reshape(B, N, 1)
    return fused_gcn_readout(x, a_orig, a_pred_new, mask3, params['gconv'],
                             params['fc1_w'], params['fc1_b'],
                             params['fc2_w'], params['fc2_b'])


# ---------------------------------------------------------------------------
if __name__ == "__main__":
    B, N, C = 2, 16, 8
    out_features = 10
    filters = [32, 64, 128]
    n_hidden = 32
    n_hidden_edge = 32

    key = jax.random.PRNGKey(0)
    keys = jax.random.split(key, 16)

    def lin(k, fan_in, shape):
        return (jax.random.normal(k, shape, dtype=jnp.float32)
                / jnp.sqrt(jnp.float32(fan_in)))

    # inputs
    x = jax.random.normal(keys[0], (B, N, C), dtype=jnp.float32)
    n_nodes = jnp.array([12, 16], dtype=jnp.int32)
    mask = (jnp.arange(N)[None, :] < n_nodes[:, None]).astype(jnp.float32)  # (B, N)

    a_raw = jax.random.uniform(keys[1], (B, N, N), dtype=jnp.float32)
    a_sym = 0.5 * (a_raw + jnp.transpose(a_raw, (0, 2, 1)))
    a_orig = (a_sym * (1.0 - jnp.eye(N, dtype=jnp.float32)[None])
              * mask[:, :, None] * mask[:, None, :])                        # (B, N, N)

    # parameters (deterministic synthetic init; shapes follow MultiCheb.__init__)
    params = {
        'edge_w1': lin(keys[2], 2 * C, (2 * C, n_hidden_edge)),
        'edge_b1': 0.1 * lin(keys[3], 1, (1, n_hidden_edge)),
        'edge_w2': lin(keys[4], n_hidden_edge, (1, n_hidden_edge)),
        'edge_b2': jnp.zeros((1, 1), jnp.float32),
        'fc1_w': lin(keys[5], filters[-1], (filters[-1], n_hidden)),
        'fc1_b': 0.1 * lin(keys[6], 1, (1, n_hidden)),
        'fc2_w': lin(keys[7], n_hidden, (n_hidden, out_features)),
        'fc2_b': 0.1 * lin(keys[8], 1, (1, out_features)),
        'gconv': [],
    }
    cin = C
    for li, f in enumerate(filters):
        params['gconv'].append((
            lin(keys[9 + li], 2 * cin, (2 * cin, f)),     # fc weight (in=2*Cin*K)
            jnp.zeros((1, f), jnp.float32),               # fc bias
            jnp.ones((1, f), jnp.float32),                # BN gamma
            jnp.zeros((1, f), jnp.float32),               # BN beta
        ))
        cin = f

    out = multicheb_forward(x, a_orig, mask, params)
    out = jax.block_until_ready(out)
    assert out.shape == (B, out_features)
    assert bool(jnp.all(jnp.isfinite(out)))
    print("KERNEL_OK")
</pallas_src>

<mosaic_0001>
module attributes {stable_mosaic.version = 11 : i64} {
  func.func @edge_adj_kernel(%arg0: i32, %arg1: memref<1x16x8xf32, #tpu.memory_space<vmem>>, %arg2: memref<1x16x1xf32, #tpu.memory_space<vmem>>, %arg3: memref<1x1x16xf32, #tpu.memory_space<vmem>>, %arg4: memref<16x32xf32, #tpu.memory_space<vmem>>, %arg5: memref<1x32xf32, #tpu.memory_space<vmem>>, %arg6: memref<1x32xf32, #tpu.memory_space<vmem>>, %arg7: memref<1x1xf32, #tpu.memory_space<vmem>>, %arg8: memref<1x16x16xf32, #tpu.memory_space<vmem>>) attributes {dimension_semantics = [#tpu.dimension_semantics<parallel>], iteration_bounds = array<i64: 2>, scalar_prefetch = 0 : i64, scratch_operands = 0 : i64, tpu.core_type = #tpu.core_type<tc>, window_params = [{transform_indices = @transform_0, window_bounds = array<i64: 1, 16, 8>}, {transform_indices = @transform_1, window_bounds = array<i64: 1, 16, 1>}, {transform_indices = @transform_2, window_bounds = array<i64: 1, 1, 16>}, {pipeline_mode = #tpu.pipeline_mode<synchronous>, transform_indices = @transform_3, window_bounds = array<i64: 16, 32>}, {pipeline_mode = #tpu.pipeline_mode<synchronous>, transform_indices = @transform_4, window_bounds = array<i64: 1, 32>}, {pipeline_mode = #tpu.pipeline_mode<synchronous>, transform_indices = @transform_5, window_bounds = array<i64: 1, 32>}, {pipeline_mode = #tpu.pipeline_mode<synchronous>, transform_indices = @transform_6, window_bounds = array<i64: 1, 1>}, {transform_indices = @transform_7, window_bounds = array<i64: 1, 16, 16>}]} {
    %c0 = arith.constant 0 : index
    %c0_0 = arith.constant 0 : index
    %c0_1 = arith.constant 0 : index
    %0 = vector.load %arg1[%c0, %c0_0, %c0_1] : memref<1x16x8xf32, #tpu.memory_space<vmem>>, vector<1x16x8xf32>
    %1 = vector.shape_cast %0 : vector<1x16x8xf32> to vector<16x8xf32>
    %c0_2 = arith.constant 0 : index
    %c0_3 = arith.constant 0 : index
    %c0_4 = arith.constant 0 : index
    %2 = vector.load %arg2[%c0_2, %c0_3, %c0_4] : memref<1x16x1xf32, #tpu.memory_space<vmem>>, vector<1x16x1xf32>
    %3 = vector.shape_cast %2 : vector<1x16x1xf32> to vector<16x1xf32>
    %c0_5 = arith.constant 0 : index
    %c0_6 = arith.constant 0 : index
    %c0_7 = arith.constant 0 : index
    %4 = vector.load %arg3[%c0_5, %c0_6, %c0_7] : memref<1x1x16xf32, #tpu.memory_space<vmem>>, vector<1x1x16xf32>
    %5 = vector.shape_cast %4 : vector<1x1x16xf32> to vector<1x16xf32>
    %c0_8 = arith.constant 0 : index
    %c0_9 = arith.constant 0 : index
    %6 = vector.load %arg4[%c0_8, %c0_9] : memref<16x32xf32, #tpu.memory_space<vmem>>, vector<16x32xf32>
    %c0_10 = arith.constant 0 : index
    %c0_11 = arith.constant 0 : index
    %7 = vector.load %arg5[%c0_10, %c0_11] : memref<1x32xf32, #tpu.memory_space<vmem>>, vector<1x32xf32>
    %c0_12 = arith.constant 0 : index
    %c0_13 = arith.constant 0 : index
    %8 = vector.load %arg6[%c0_12, %c0_13] : memref<1x32xf32, #tpu.memory_space<vmem>>, vector<1x32xf32>
    %9 = vector.extract_strided_slice %6 {offsets = [0, 0], sizes = [8, 32], strides = [1, 1]} : vector<16x32xf32> to vector<8x32xf32>
    %cst = arith.constant dense<0.000000e+00> : vector<16x32xf32>
    %10 = tpu.matmul %1, %9, %cst {dimension_numbers = #tpu.dot_dimension_numbers<[1], [0], [0], [1], [0, 0, 1, 1], [], []>} : vector<16x8xf32>, vector<8x32xf32>, vector<16x32xf32> -> vector<16x32xf32>
    %11 = vector.extract_strided_slice %6 {offsets = [8, 0], sizes = [8, 32], strides = [1, 1]} : vector<16x32xf32> to vector<8x32xf32>
    %cst_14 = arith.constant dense<0.000000e+00> : vector<16x32xf32>
    %12 = tpu.matmul %1, %11, %cst_14 {dimension_numbers = #tpu.dot_dimension_numbers<[1], [0], [0], [1], [0, 0, 1, 1], [], []>} : vector<16x8xf32>, vector<8x32xf32>, vector<16x32xf32> -> vector<16x32xf32>
    %13 = vector.shape_cast %10 : vector<16x32xf32> to vector<16x1x32xf32>
    %14 = vector.shape_cast %12 : vector<16x32xf32> to vector<1x16x32xf32>
    %15 = vector.broadcast %13 : vector<16x1x32xf32> to vector<16x16x32xf32>
    %16 = vector.broadcast %14 : vector<1x16x32xf32> to vector<16x16x32xf32>
    %17 = arith.addf %15, %16 : vector<16x16x32xf32>
    %18 = vector.shape_cast %7 : vector<1x32xf32> to vector<1x1x32xf32>
    %19 = vector.broadcast %18 : vector<1x1x32xf32> to vector<16x16x32xf32>
    %20 = arith.addf %17, %19 : vector<16x16x32xf32>
    %cst_15 = arith.constant 0.000000e+00 : f32
    %21 = vector.broadcast %cst_15 : f32 to vector<16x16x32xf32>
    %22 = arith.maximumf %20, %21 : vector<16x16x32xf32>
    %23 = vector.shape_cast %8 : vector<1x32xf32> to vector<1x1x32xf32>
    %24 = vector.broadcast %23 : vector<1x1x32xf32> to vector<16x16x32xf32>
    %25 = arith.mulf %22, %24 : vector<16x16x32xf32>
    %cst_16 = arith.constant dense<0.000000e+00> : vector<16x16xf32>
    %26 = vector.multi_reduction <add>, %25, %cst_16 [2] : vector<16x16x32xf32> to vector<16x16xf32>
    %27 = tpu.transpose %26, [1, 0] : vector<16x16xf32> -> vector<16x16xf32>
    %28 = arith.addf %26, %27 : vector<16x16xf32>
    %c0_17 = arith.constant 0 : index
    %c0_18 = arith.constant 0 : index
    %29 = vector.load %arg7[%c0_17, %c0_18] : memref<1x1xf32, #tpu.memory_space<vmem>>, vector<1x1xf32>
    %cst_19 = arith.constant 2.000000e+00 : f32
    %30 = vector.broadcast %cst_19 : f32 to vector<1x1xf32>
    %31 = arith.mulf %30, %29 : vector<1x1xf32>
    %32 = vector.broadcast %31 : vector<1x1xf32> to vector<16x16xf32>
    %33 = arith.addf %28, %32 : vector<16x16xf32>
    %34 = tpu.iota {dimensions = array<i32: 0>} : vector<16x16xi32>
    %35 = tpu.iota {dimensions = array<i32: 1>} : vector<16x16xi32>
    %36 = arith.cmpi slt, %34, %35 : vector<16x16xi32>
    %37 = vector.broadcast %3 : vector<16x1xf32> to vector<16x16xf32>
    %38 = vector.broadcast %5 : vector<1x16xf32> to vector<16x16xf32>
    %39 = arith.mulf %37, %38 : vector<16x16xf32>
    %cst_20 = arith.constant 5.000000e-01 : f32
    %40 = vector.broadcast %cst_20 : f32 to vector<16x16xf32>
    %41 = arith.cmpf ogt, %39, %40 : vector<16x16xf32>
    %42 = arith.andi %36, %41 : vector<16x16xi1>
    %cst_21 = arith.constant 5.000000e-01 : f32
    %43 = vector.broadcast %cst_21 : f32 to vector<16x16xf32>
    %44 = arith.mulf %43, %33 : vector<16x16xf32>
    %cst_22 = arith.constant -1.000000e+30 : f32
    %45 = vector.broadcast %cst_22 : f32 to vector<16x16xf32>
    %46 = arith.select %42, %44, %45 : vector<16x16xi1>, vector<16x16xf32>
    %47 = math.exp %46 : vector<16x16xf32>
    %cst_23 = arith.constant dense<0.000000e+00> : vector<16xf32>
    %48 = vector.multi_reduction <add>, %47, %cst_23 [1] : vector<16x16xf32> to vector<16xf32>
    %49 = vector.shape_cast %48 : vector<16xf32> to vector<16x1xf32>
    %cst_24 = arith.constant 0.000000e+00 : f32
    %50 = vector.broadcast %cst_24 : f32 to vector<16x1xf32>
    %51 = arith.cmpf oeq, %49, %50 : vector<16x1xf32>
    %cst_25 = arith.constant 1.000000e+00 : f32
    %52 = vector.broadcast %cst_25 : f32 to vector<16x1xf32>
    %53 = arith.select %51, %52, %49 : vector<16x1xi1>, vector<16x1xf32>
    %54 = vector.broadcast %53 : vector<16x1xf32> to vector<16x16xf32>
    %55 = arith.divf %47, %54 : vector<16x16xf32>
    %56 = tpu.transpose %55, [1, 0] : vector<16x16xf32> -> vector<16x16xf32>
    %57 = arith.addf %55, %56 : vector<16x16xf32>
    %c0_26 = arith.constant 0 : index
    %c0_27 = arith.constant 0 : index
    %c0_28 = arith.constant 0 : index
    %58 = vector.load %arg8[%c0_26, %c0_27, %c0_28] : memref<1x16x16xf32, #tpu.memory_space<vmem>>, vector<1x16x16xf32>
    %59 = vector.shape_cast %58 : vector<1x16x16xf32> to vector<16x16xf32>
    %60 = vector.shape_cast %57 : vector<16x16xf32> to vector<1x16x16xf32>
    tpu.vector_store %arg8[%c0_26, %c0_27, %c0_28], %60 {strides = array<i32>} : memref<1x16x16xf32, #tpu.memory_space<vmem>>, vector<1x16x16xf32>,
    return
  }
  func.func @transform_0(%arg0: i32) -> (i32, i32, i32) {
    %c0_i32 = arith.constant 0 : i32
    %c0_i32_0 = arith.constant 0 : i32
    %c0_i32_1 = arith.constant 0 : i32
    return %arg0, %c0_i32, %c0_i32_0 : i32, i32, i32
  }
  func.func @transform_1(%arg0: i32) -> (i32, i32, i32) {
    %c0_i32 = arith.constant 0 : i32
    %c0_i32_0 = arith.constant 0 : i32
    %c0_i32_1 = arith.constant 0 : i32
    return %arg0, %c0_i32, %c0_i32_0 : i32, i32, i32
  }
  func.func @transform_2(%arg0: i32) -> (i32, i32, i32) {
    %c0_i32 = arith.constant 0 : i32
    %c0_i32_0 = arith.constant 0 : i32
    %c0_i32_1 = arith.constant 0 : i32
    return %arg0, %c0_i32, %c0_i32_0 : i32, i32, i32
  }
  func.func @transform_3(%arg0: i32) -> (i32, i32) {
    %c0_i32 = arith.constant 0 : i32
    %c0_i32_0 = arith.constant 0 : i32
    %c0_i32_1 = arith.constant 0 : i32
    return %c0_i32, %c0_i32_0 : i32, i32
  }
  func.func @transform_4(%arg0: i32) -> (i32, i32) {
    %c0_i32 = arith.constant 0 : i32
    %c0_i32_0 = arith.constant 0 : i32
    %c0_i32_1 = arith.constant 0 : i32
    return %c0_i32, %c0_i32_0 : i32, i32
  }
  func.func @transform_5(%arg0: i32) -> (i32, i32) {
    %c0_i32 = arith.constant 0 : i32
    %c0_i32_0 = arith.constant 0 : i32
    %c0_i32_1 = arith.constant 0 : i32
    return %c0_i32, %c0_i32_0 : i32, i32
  }
  func.func @transform_6(%arg0: i32) -> (i32, i32) {
    %c0_i32 = arith.constant 0 : i32
    %c0_i32_0 = arith.constant 0 : i32
    %c0_i32_1 = arith.constant 0 : i32
    return %c0_i32, %c0_i32_0 : i32, i32
  }
  func.func @transform_7(%arg0: i32) -> (i32, i32, i32) {
    %c0_i32 = arith.constant 0 : i32
    %c0_i32_0 = arith.constant 0 : i32
    %c0_i32_1 = arith.constant 0 : i32
    return %arg0, %c0_i32, %c0_i32_0 : i32, i32, i32
  }
}

</mosaic_0001>

<bundles_post_ra>
// kernel: tpu_custom_call.1
= control target key start
LH: loop header
LB: loop body
LE: loop exit
PB: predicated region body
PF: predicated region fallthrough
CT: control target
= control target key end

     0   :  { %s2798_s0 = inlined_call_operand.vmem [shape: f32[2,16,8], index: 0, kind: input, shape index: {}]   ;;  %s2799_s1 = inlined_call_operand.vmem [shape: f32[2,16,1], index: 1, kind: input, shape index: {}]   ;;  %s2800_s2 = inlined_call_operand.vmem [shape: f32[2,1,16], index: 2, kind: input, shape index: {}]   ;;  %s2801_s3 = inlined_call_operand.vmem [shape: f32[16,32], index: 3, kind: input, shape index: {}]   ;;  %s2802_s4 = inlined_call_operand.vmem [shape: f32[1,32], index: 4, kind: input, shape index: {}]   ;;  %s2803_s5 = inlined_call_operand.vmem [shape: f32[1,32], index: 5, kind: input, shape index: {}]   ;;  %s2804_s6 = inlined_call_operand.<no memory space> [shape: f32[1,1], index: 6, kind: input, shape index: {}]   ;;  %s2805_s7 = inlined_call_operand.hbm [shape: f32[2,16,16], index: 7, kind: output, shape index: {}]  }
   0x1   :  { %v12_v0 = vstv %s2804_s6 }
   0x2   :  { %13 = vst [vmem:[#allocation2] sm:$0x1] %v12_v0 }
   0x3   :  { %14 = vsyncpa [#allocation4], 0 }
   0x4   :  { %16 = vsyncpa [#allocation4 + $0x1], 0  ;;  %s2123_s26 = smov 0   ;;  %s2125_s27 = smov 0  }
   0x5   :  { %s2127_s28 = smov 0   ;;  %s2129_s29 = smov 0  }
   0x6 LB: > { %s2144_s6 = sadd.s32 4294967295, %s2073_s29   ;;  %s1917_s30 = sadd.s32 4294967294, %s2073_s29   ;;  %s2073_s29 = sphi %s2129_s29, %s2811_s29   ;;  %s2069_s28 = sphi %s2127_s28, %s2810_s28   ;;  %s2065_s27 = sphi %s2125_s27, %s2809_s27   ;;  %s2061_s26 = sphi %s2123_s26, %s2808_s26  }
   0x7   : > { %s2148_s8 = sadd.s32 1, %s2073_s29   ;;  %s191_s9 = sadd.s32 1, %s2069_s28 }
   0x8   : > { %s188_s10 = ssub.s32 %s2073_s29, %s2148_s8  ;;  %p201_p0 = scmp.ne.s32.totalorder %s2069_s28, %s2065_s27 }
   0x9   : > { %p189_p1 = scmp.eq.s32.totalorder %s188_s10, 0  ;;  %p202_p2 = scmp.eq.s32.totalorder %s2144_s6, 1 }
   0xa   : > { %p207_p3 = scmp.ne.s32.totalorder %s2065_s27, %s2061_s26  ;;  %p208_p4 = scmp.eq.s32.totalorder %s1917_s30, 1 }
   0xb   : > { %s2159_s11 = scalar_select %p189_p1, %s2069_s28, %s191_s9  }
   0xc   : > { %p2161_p5 = por %p202_p2, %p201_p0  ;;  %p2165_p6 = por %p208_p4, %p207_p3 }
   0xd   : > { %p1920_p7 = scmp.ge.s32.totalorder %s2073_s29, 1  ;;  %p260_p8 = scmp.lt.s32.totalorder %s2073_s29, 3 }
   0xf   : > { %p261_p9 = pnand %p1920_p7, %p260_p8 }
  0x10   : > { %v318_v1 = vld [vmem:[%s2801_s3] sm:$0xff] (!%p261_p9)  ;;  %p300_p10 = scmp.lt.s32.totalorder (!%p261_p9), %s2144_s6, 1  ;;  %v319_v2 = vld [vmem:[%s2801_s3 + $0x8] sm:$0xff] (!%p261_p9)  ;;  %v485_v3 = vlaneseq (!%p261_p9)  ;;  %v2075_v7 = vmov (!%p261_p9), 0   ;;  %vm322_vm0 = vcmask (!%p261_p9), 64512   ;;  %vm799_vm1 = vcmask (!%p261_p9), 261120  }
  0x11   : > { %264 = sbr.rel (%p261_p9) target bundleno = 1262 (0x4ee), region = 48  ;;  %1947 = vmatprep.subr.mxu0 (!%p261_p9), %v318_v1  ;;  %1952 = vmatprep.subr.mxu1 (!%p261_p9), %v319_v2  ;;  %v1373_v4 = vld [vmem:[#allocation2] sm:$0x1] (!%p261_p9)  ;;  %v2076_v13 = vmov (!%p261_p9), 1966171168   ;;  %vm939_vm2 = vcmask (!%p261_p9), 130112  }
  0x12   : > { %1948 = vmatpush3.msra.mxu0 (!%p261_p9), %v318_v1  ;;  %1953 = vmatpush3.msra.mxu1 (!%p261_p9), %v319_v2  ;;  %v2182_v5 = vshrl.u32 (!%p261_p9), %v485_v3, 7  ;;  %v1374_v6 = vmul.f32 (!%p261_p9), 2.0, %v1373_v4  ;;  %v483_v14 = vunpack.c.l.s4 (!%p261_p9), %v2076_v13  ;;  %v2229_v38 = vld [vmem:[%s2802_s4] ss:$0 sm:$0xff] (!%p261_p9)  ;;  %vm1076_vm3 = vcmask (!%p261_p9), 1041409  }
  0x13   : > { %2001 = vset.pattern.permute.xlu1 (!%p261_p9), %v2075_v7  ;;  %2002 = vset.pattern.permute.xlu0 (!%p261_p9), %v2075_v7  ;;  %v2247_v51 = vld [vmem:[%s2803_s5] ss:$0 sm:$0xff] (!%p261_p9)  ;;  %vm1078_vm4 = vcmask (!%p261_p9), 1042434   ;;  %vm1080_vm5 = vcmask (!%p261_p9), 1043459   ;;  %vm1082_vm6 = vcmask (!%p261_p9), 1044484   ;;  %vm1084_vm7 = vcmask (!%p261_p9), 1045509  }
  0x14   : > { %v2186_v8 = vsub.s32 (!%p261_p9), 0, %v2182_v5  ;;  %v484_v15 = vunpack.c.0.s8 (!%p261_p9), %v483_v14  ;;  %vm1086_vm8 = vcmask (!%p261_p9), 1046534   ;;  %vm1088_vm9 = vcmask (!%p261_p9), 1047559  }
  0x15   : > { %vm1769_vm13 = vcmask (!%p261_p9), 130048  }
  0x16   : > { %v1379_v11 = vrot.slane (!%p261_p9), %v1374_v6, %v2186_v8  ;;  %v2199_v16 = vsub.s32 (!%p261_p9), %v484_v15, %v2182_v5 }
  0x18   : > { %s2179_s18 = scalar_select %p300_p10, %s2144_s6, 1  ;;  %1381 = vperm.xlu1 %2001, %v1379_v11  }
  0x1a   : > { %s1938_s19 = sshll.u32 %s2179_s18, 4  ;;  %s312_s17 = scalar_lea.vmem %s2800_s2, %s2179_s18 }
  0x1b   : > { %s304_s22 = scalar_lea.vmem %s2798_s0, %s1938_s19  ;;  %s2195_s25 = scalar_lea.vmem %s2799_s1, %s1938_s19 }
  0x1c   : > { %v313_v9 = vld [vmem:[%s304_s22] sm:$0xff]  ;;  %v314_v10 = vld [vmem:[%s304_s22 + $0x8] sm:$0xff]  ;;  %s297_s18 = sand.u32 1, %s2065_s27   ;;  %s1940_s22 = sshll.u32 %s2144_s6, 8 }
  0x1d   : > { %1949 = vmatprep.mubr.msk.f32.mxu0 %vm322_vm0, %v313_v9  ;;  %1954 = vmatprep.mubr.msk.f32.mxu1 %vm322_vm0, %v313_v9  ;;  %v315_v12 = vld [vmem:[%s2195_s25] sm:$0xff]  ;;  %s1921_s19 = sshll.u32 %s297_s18, 4  ;;  %s2757_s30 = scalar_lea.sflag [#allocation4], %s297_s18 }
  0x1e   : > { %1950 = vmatmul.mubr.msk.f32.vlgmr.msra.gmra.mrb[0].mxu0 %vm322_vm0, %v314_v10  ;;  %1955 = vmatmul.mubr.msk.f32.vlgmr.msra.gmra.mrb[0].mxu1 %vm322_vm0, %v314_v10  ;;  %s299_s20 = scalar_lea.vmem [#allocation3], %s1921_s19  ;;  %s2077_s6 = smov [#allocation3]  }
  0x1f   : > { %1423 = vperm.xlu1 %2001, %v315_v12   ;;  %s1834_s21 = sshll.u32 %s299_s20, 4  ;;  %s2015_s10 = sshll.u32 %s2077_s6, 4  ;;  %s2749_s21 = int_to_ptr.vmem [resolvable:$true] %s1834_s21  ;;  %s2016_s10 = int_to_ptr.vmem [resolvable:$false] %s2015_s10 }
  0x20   : > { %s2011_s9 = scalar_lea.vmem %s2749_s21, 256  ;;  %s2017_s14 = scalar_lea.vmem %s2016_s10, 512 }
  0x21   : > { %p2012_p11 = scmp.ne.s32.totalorder %s2749_s21, %s2011_s9  ;;  %p2018_p0 = scmp.lt.s32.totalorder %s2749_s21, %s2016_s10 }
  0x22   : > { %p2019_p1 = scmp.lt.s32.totalorder %s2017_s14, %s2011_s9 }
  0x23   : > { %p2013_p12 = pnand %p2012_p11, %p2161_p5 }
  0x24   : > { %p2020_p2 = por %p2019_p1, %p2018_p0 }
  0x25   : > { %p2014_p13 = pneg %p2013_p12 }
  0x27   : > { %p2021_p3 = pnand %p2020_p2, %p2014_p13 }
  0xf1   : > { %v1951_v17 = vpop.f32.mrb[0].mxu0  ;;  %v2201_v18 = vpop.f32.mrb[0].mxu1 }
  0xf2   : > { %v530_v19 = vcombine.high %v1951_v17, %v1951_v17  ;;  %v537_v20 = vrot.slane %v1951_v17, %v2199_v16  ;;  %v395_v21 = vpop.f32.mrb[1].mxu0  ;;  %v2204_v22 = vpop.f32.mrb[1].mxu1 }
  0xf3   : > { %v488_v23 = vrot.slane %v395_v21, %v2199_v16  ;;  %v481_v32 = vcombine.high %v395_v21, %v395_v21 }
  0xf4   : > { %v2208_v24 = vrot.slane %v530_v19, %v2199_v16  ;;  %v545_v25 = vcombine.high %v537_v20, %v537_v20  ;;  %v553_v26 = vrot.slane %v537_v20, %v2199_v16 }
  0xf5   : > { %v504_v30 = vrot.slane %v488_v23, %v2199_v16  ;;  %v496_v33 = vcombine.high %v488_v23, %v488_v23  ;;  %v495_v39 = vrot.slane %v481_v32, %v2199_v16 }
  0xf6   : > { %v2213_v27 = vrot.slane %v2208_v24, %v2199_v16  ;;  %v2216_v28 = vrot.slane %v545_v25, %v2199_v16  ;;  %v575_v29 = vcombine.high %v553_v26, %v553_v26  ;;  %v614_v31 = vrot.slane %v553_v26, %v2186_v8 }
  0xf7   : > { %v582_v37 = vrot.slane %v504_v30, %v2186_v8  ;;  %v2233_v40 = vrot.slane %v496_v33, %v2199_v16  ;;  %v526_v41 = vcombine.high %v504_v30, %v504_v30  ;;  %v2254_v56 = vrot.slane %v495_v39, %v2199_v16 }
  0xf8   : > { %v618_v34 = vrot.slane %v2216_v28, %v2186_v8  ;;  %v622_v35 = vrot.slane %v575_v29, %v2186_v8  ;;  %v630_v36 = vrot.slane %v2213_v27, %v2186_v8  ;;  %v676_v42 = vadd.f32 %v2201_v18, %v614_v31 }
  0xf9   : > { %v675_v43 = vadd.f32 %v614_v31, %v2204_v22  ;;  %v659_v45 = vadd.f32 %v582_v37, %v2204_v22  ;;  %v660_v48 = vadd.f32 %v2201_v18, %v582_v37  ;;  %v586_v2 = vrot.slane %v2233_v40, %v2186_v8 }
  0xfa   : > { %v678_v44 = vadd.f32 %v2201_v18, %v618_v34  ;;  %v680_v46 = vadd.f32 %v2201_v18, %v622_v35  ;;  %v714_v47 = vadd.f32 %v2229_v38, %v676_v42  ;;  %v684_v49 = vadd.f32 %v2201_v18, %v630_v36 }
  0xfb   : > { %v677_v50 = vadd.f32 %v618_v34, %v2204_v22  ;;  %v713_v52 = vadd.f32 %v2229_v38, %v675_v43  ;;  %v697_v54 = vadd.f32 %v2229_v38, %v659_v45  ;;  %v698_v58 = vadd.f32 %v2229_v38, %v660_v48 }
  0xfc   : > { %v716_v53 = vadd.f32 %v2229_v38, %v678_v44  ;;  %v718_v55 = vadd.f32 %v2229_v38, %v680_v46  ;;  %v746_v57 = vmax.f32 %v714_v47, 0.0  ;;  %v722_v62 = vadd.f32 %v2229_v38, %v684_v49 }
  0xfd   : > { %v745_v59 = vmax.f32 %v713_v52, 0.0  ;;  %v729_v61 = vmax.f32 %v697_v54, 0.0  ;;  %v715_v1 = vadd.f32 %v2229_v38, %v677_v50  ;;  %v590_v4 = vrot.slane %v526_v41, %v2186_v8 }
  0xfe   : > { %v748_v60 = vmax.f32 %v716_v53, 0.0  ;;  %v784_v63 = vmul.f32 %v2247_v51, %v746_v57  ;;  %v750_v0 = vmax.f32 %v718_v55, 0.0  ;;  %v546_v9 = vcombine.high %v2208_v24, %v2208_v24 }
  0xff   : > { %v783_v6 = vmul.f32 %v2247_v51, %v745_v59  ;;  %v497_v10 = vcombine.high %v495_v39, %v495_v39  ;;  %v598_v11 = vrot.slane %v2254_v56, %v2186_v8  ;;  %v767_v14 = vmul.f32 %v2247_v51, %v729_v61 }
 0x100   : > { %v786_v7 = vmul.f32 %v2247_v51, %v748_v60  ;;  %v851_v12 = vsel %vm799_vm1, %v784_v63, 0.0  ;;  %v730_v15 = vmax.f32 %v698_v58, 0.0  ;;  %v754_v17 = vmax.f32 %v722_v62, 0.0 }
 0x101   : > { %852 = vadd.xlane.f32.xlu1 %v851_v12  ;;  %v848_v13 = vsel %vm799_vm1, %v783_v6, 0.0  ;;  %v788_v20 = vmul.f32 %v2247_v51, %v750_v0  ;;  %v747_v21 = vmax.f32 %v715_v1, 0.0  ;;  %v679_v23 = vadd.f32 %v622_v35, %v2204_v22 }
 0x102   : > { %849 = vadd.xlane.f32.xlu0 %v848_v13  ;;  %v857_v19 = vsel %vm799_vm1, %v786_v7, 0.0  ;;  %v661_v24 = vadd.f32 %v586_v2, %v2204_v22  ;;  %v683_v25 = vadd.f32 %v630_v36, %v2204_v22  ;;  %v662_v26 = vadd.f32 %v2201_v18, %v586_v2 }
 0x103   : > { %v663_v29 = vadd.f32 %v590_v4, %v2204_v22  ;;  %v717_v30 = vadd.f32 %v2229_v38, %v679_v23  ;;  %v664_v31 = vadd.f32 %v2201_v18, %v590_v4  ;;  %v668_v32 = vadd.f32 %v2201_v18, %v598_v11 }
 0x104   : > { %v667_v33 = vadd.f32 %v598_v11, %v2204_v22  ;;  %v528_v34 = vcombine.high %v2233_v40, %v2233_v40  ;;  %v800_v35 = vsel %vm799_vm1, %v767_v14, 0.0  ;;  %v768_v36 = vmul.f32 %v2247_v51, %v730_v15 }
 0x105   : > { %858 = vadd.xlane.f32.xlu1 %v857_v19  ;;  %v699_v37 = vadd.f32 %v2229_v38, %v661_v24  ;;  %v2289_v39 = vrot.slane %v497_v10, %v2199_v16  ;;  %v792_v41 = vmul.f32 %v2247_v51, %v754_v17  ;;  %v785_v42 = vmul.f32 %v2247_v51, %v747_v21 }
 0x106   : > { %801 = vadd.xlane.f32.xlu0 %v800_v35  ;;  %v577_v43 = vcombine.high %v2216_v28, %v2216_v28  ;;  %v721_v40 = vadd.f32 %v2229_v38, %v683_v25  ;;  %v700_v44 = vadd.f32 %v2229_v38, %v662_v26  ;;  %v701_v45 = vadd.f32 %v2229_v38, %v663_v29 }
 0x107   : > { %v863_v46 = vsel %vm799_vm1, %v788_v20, 0.0  ;;  %v749_v47 = vmax.f32 %v717_v30, 0.0  ;;  %v731_v48 = vmax.f32 %v699_v37, 0.0  ;;  %v702_v49 = vadd.f32 %v2229_v38, %v664_v31 }
 0x108   : > { %v2301_v50 = vrot.slane %v546_v9, %v2199_v16  ;;  %v576_v52 = vcombine.high %v2213_v27, %v2213_v27  ;;  %v594_v28 = vrot.slane %v528_v34, %v2186_v8  ;;  %v803_v53 = vsel %vm799_vm1, %v768_v36, 0.0 }
 0x109   : > { %864 = vadd.xlane.f32.xlu1 %v863_v46  ;;  %v602_v54 = vrot.slane %v2289_v39, %v2186_v8  ;;  %v875_v55 = vsel %vm799_vm1, %v792_v41, 0.0  ;;  %v854_v57 = vsel %vm799_vm1, %v785_v42, 0.0  ;;  %v706_v58 = vadd.f32 %v2229_v38, %v668_v32 }
 0x10a   : > { %804 = vadd.xlane.f32.xlu0 %v803_v53  ;;  %v753_v16 = vmax.f32 %v721_v40, 0.0  ;;  %v732_v59 = vmax.f32 %v700_v44, 0.0  ;;  %v733_v60 = vmax.f32 %v701_v45, 0.0  ;;  %v705_v27 = vadd.f32 %v2229_v38, %v667_v33 }
 0x10b   : > { %v787_v61 = vmul.f32 %v2247_v51, %v749_v47  ;;  %v769_v62 = vmul.f32 %v2247_v51, %v731_v48  ;;  %v734_v63 = vmax.f32 %v702_v49, 0.0  ;;  %v626_v0 = vrot.slane %v577_v43, %v2186_v8 }
 0x10c   : > { %v634_v1 = vrot.slane %v2301_v50, %v2186_v8  ;;  %v638_v2 = vrot.slane %v576_v52, %v2186_v8  ;;  %v666_v4 = vadd.f32 %v2201_v18, %v594_v28  ;;  %v2321_v6 = vadd.f32 %v594_v28, %v2204_v22 }
 0x10d   : > { %876 = vadd.xlane.f32.xlu1 %v875_v55  ;;  %v682_v7 = vadd.f32 %v2201_v18, %v626_v0  ;;  %v681_v9 = vadd.f32 %v626_v0, %v2204_v22  ;;  %v2326_v10 = vadd.f32 %v2201_v18, %v602_v54  ;;  %v2329_v11 = vadd.f32 %v602_v54, %v2204_v22 }
 0x10e   : > { %855 = vadd.xlane.f32.xlu0 %v854_v57  ;;  %v686_v12 = vadd.f32 %v2201_v18, %v634_v1  ;;  %v685_v13 = vadd.f32 %v634_v1, %v2204_v22  ;;  %v688_v14 = vadd.f32 %v2201_v18, %v638_v2  ;;  %v687_v15 = vadd.f32 %v638_v2, %v2204_v22 }
 0x10f   : > { %v527_v17 = vcombine.high %v2254_v56, %v2254_v56  ;;  %v806_v19 = vsel %vm799_vm1, %v769_v62, 0.0  ;;  %v770_v20 = vmul.f32 %v2247_v51, %v732_v59  ;;  %v860_v21 = vsel %vm799_vm1, %v787_v61, 0.0 }
 0x110   : > { %v791_v23 = vmul.f32 %v2247_v51, %v753_v16  ;;  %v771_v24 = vmul.f32 %v2247_v51, %v733_v60  ;;  %v772_v25 = vmul.f32 %v2247_v51, %v734_v63  ;;  %v738_v26 = vmax.f32 %v706_v58, 0.0 }
 0x111   : > { %807 = vadd.xlane.f32.xlu1 %v806_v19  ;;  %v737_v29 = vmax.f32 %v705_v27, 0.0  ;;  %v606_v30 = vrot.slane %v527_v17, %v2186_v8  ;;  %v809_v56 = vsel %vm799_vm1, %v770_v20, 0.0  ;;  %v720_v31 = vadd.f32 %v2229_v38, %v682_v7 }
 0x112   : > { %861 = vadd.xlane.f32.xlu0 %v860_v21  ;;  %v578_v32 = vcombine.high %v2301_v50, %v2301_v50  ;;  %v529_v33 = vcombine.high %v2289_v39, %v2289_v39  ;;  %v872_v34 = vsel %vm799_vm1, %v791_v23, 0.0  ;;  %v719_v35 = vadd.f32 %v2229_v38, %v681_v9 }
 0x113   : > { %v812_v36 = vsel %vm799_vm1, %v771_v24, 0.0  ;;  %v815_v37 = vsel %vm799_vm1, %v772_v25, 0.0  ;;  %v776_v41 = vmul.f32 %v2247_v51, %v738_v26  ;;  %v775_v42 = vmul.f32 %v2247_v51, %v737_v29 }
 0x114   : > { %v752_v43 = vmax.f32 %v720_v31, 0.0  ;;  %v724_v40 = vadd.f32 %v2229_v38, %v686_v12  ;;  %v672_v44 = vadd.f32 %v2201_v18, %v606_v30  ;;  %v671_v39 = vadd.f32 %v606_v30, %v2204_v22 }
 0x115   : > { %810 = vadd.xlane.f32.xlu1 %v809_v56  ;;  %v751_v45 = vmax.f32 %v719_v35, 0.0  ;;  %v723_v46 = vadd.f32 %v2229_v38, %v685_v13  ;;  %v642_v47 = vrot.slane %v578_v32, %v2186_v8  ;;  %v610_v48 = vrot.slane %v529_v33, %v2186_v8 }
 0x116   : > { %873 = vadd.xlane.f32.xlu0 %v872_v34  ;;  %v827_v53 = vsel %vm799_vm1, %v776_v41, 0.0  ;;  %v790_v54 = vmul.f32 %v2247_v51, %v752_v43  ;;  %v756_v55 = vmax.f32 %v724_v40, 0.0  ;;  %v726_v57 = vadd.f32 %v2229_v38, %v688_v14 }
 0x117   : > { %v690_v49 = vadd.f32 %v2201_v18, %v642_v47  ;;  %v689_v50 = vadd.f32 %v642_v47, %v2204_v22  ;;  %v674_v52 = vadd.f32 %v2201_v18, %v610_v48  ;;  %v673_v28 = vadd.f32 %v610_v48, %v2204_v22 }
 0x118   : > { %v824_v58 = vsel %vm799_vm1, %v775_v42, 0.0  ;;  %v789_v16 = vmul.f32 %v2247_v51, %v751_v45  ;;  %v755_v59 = vmax.f32 %v723_v46, 0.0  ;;  %v725_v60 = vadd.f32 %v2229_v38, %v687_v15 }
 0x119   : > { %816 = vadd.xlane.f32.xlu1 %v815_v37  ;;  %v869_v18 = vsel %vm799_vm1, %v790_v54, 0.0  ;;  %v794_v22 = vmul.f32 %v2247_v51, %v756_v55  ;;  %v758_v27 = vmax.f32 %v726_v57, 0.0  ;;  %v704_v61 = vadd.f32 %v2229_v38, %v666_v4  ;;  %v2416_v54 = vpop.permute.xlu1 %1381 }
 0x11a   : > { %813 = vadd.xlane.f32.xlu0 %v812_v36  ;;  %v866_v62 = vsel %vm799_vm1, %v789_v16, 0.0  ;;  %v793_v63 = vmul.f32 %v2247_v51, %v755_v59  ;;  %v757_v0 = vmax.f32 %v725_v60, 0.0  ;;  %v703_v1 = vadd.f32 %v2229_v38, %v2321_v6 }
 0x11b   : > { %v881_v2 = vsel %vm799_vm1, %v794_v22, 0.0  ;;  %v796_v7 = vmul.f32 %v2247_v51, %v758_v27  ;;  %v736_v9 = vmax.f32 %v704_v61, 0.0  ;;  %v708_v12 = vadd.f32 %v2229_v38, %v2326_v10 }
 0x11c   : > { %v878_v4 = vsel %vm799_vm1, %v793_v63, 0.0  ;;  %v795_v13 = vmul.f32 %v2247_v51, %v757_v0  ;;  %v735_v14 = vmax.f32 %v703_v1, 0.0  ;;  %v707_v15 = vadd.f32 %v2229_v38, %v2329_v11 }
 0x11d   : > { %828 = vadd.xlane.f32.xlu1 %v827_v53  ;;  %v887_v6 = vsel %vm799_vm1, %v796_v7, 0.0  ;;  %v774_v17 = vmul.f32 %v2247_v51, %v736_v9  ;;  %v740_v19 = vmax.f32 %v708_v12, 0.0  ;;  %v710_v20 = vadd.f32 %v2229_v38, %v672_v44  ;;  %v316_v53 = vld [vmem:[%s2195_s25 + $0x8] sm:$0xff]  ;;  %v2418_v55 = vpop.permute.xlu1 %1423  ;;  %s2754_s25 = scalar_lea.hbm %s2805_s7, %s1940_s22 }
 0x11e   : > { %825 = vadd.xlane.f32.xlu0 %v824_v58  ;;  %v884_v10 = vsel %vm799_vm1, %v795_v13, 0.0  ;;  %v773_v21 = vmul.f32 %v2247_v51, %v735_v14  ;;  %v739_v23 = vmax.f32 %v707_v15, 0.0  ;;  %v709_v24 = vadd.f32 %v2229_v38, %v671_v39 }
 0x11f   : > { %v821_v25 = vsel %vm799_vm1, %v774_v17, 0.0  ;;  %v778_v11 = vmul.f32 %v2247_v51, %v740_v19  ;;  %v742_v26 = vmax.f32 %v710_v20, 0.0  ;;  %v728_v29 = vadd.f32 %v2229_v38, %v690_v49 }
 0x120   : > { %v818_v30 = vsel %vm799_vm1, %v773_v21, 0.0  ;;  %v777_v56 = vmul.f32 %v2247_v51, %v739_v23  ;;  %v741_v31 = vmax.f32 %v709_v24, 0.0  ;;  %v727_v32 = vadd.f32 %v2229_v38, %v689_v50 }
 0x121   : > { %870 = vadd.xlane.f32.xlu1 %v869_v18  ;;  %v833_v33 = vsel %vm799_vm1, %v778_v11, 0.0  ;;  %v780_v34 = vmul.f32 %v2247_v51, %v742_v26  ;;  %v760_v35 = vmax.f32 %v728_v29, 0.0  ;;  %v712_v36 = vadd.f32 %v2229_v38, %v674_v52 }
 0x122   : > { %867 = vadd.xlane.f32.xlu0 %v866_v62  ;;  %v830_v37 = vsel %vm799_vm1, %v777_v56, 0.0  ;;  %v779_v41 = vmul.f32 %v2247_v51, %v741_v31  ;;  %v759_v42 = vmax.f32 %v727_v32, 0.0  ;;  %v711_v43 = vadd.f32 %v2229_v38, %v673_v28 }
 0x123   : > { %v839_v40 = vsel %vm799_vm1, %v780_v34, 0.0  ;;  %v798_v44 = vmul.f32 %v2247_v51, %v760_v35  ;;  %v744_v39 = vmax.f32 %v712_v36, 0.0 }
 0x124   : > { %v836_v45 = vsel %vm799_vm1, %v779_v41, 0.0  ;;  %v797_v46 = vmul.f32 %v2247_v51, %v759_v42  ;;  %v743_v47 = vmax.f32 %v711_v43, 0.0 }
 0x125   : > { %882 = vadd.xlane.f32.xlu1 %v881_v2  ;;  %v893_v48 = vsel %vm799_vm1, %v798_v44, 0.0  ;;  %v782_v49 = vmul.f32 %v2247_v51, %v744_v39 }
 0x126   : > { %879 = vadd.xlane.f32.xlu0 %v878_v4  ;;  %v890_v38 = vsel %vm799_vm1, %v797_v46, 0.0  ;;  %v781_v50 = vmul.f32 %v2247_v51, %v743_v47 }
 0x127   : > { %v845_v52 = vsel %vm799_vm1, %v782_v49, 0.0 }
 0x128   : > { %v842_v28 = vsel %vm799_vm1, %v781_v50, 0.0 }
 0x129   : > { %888 = vadd.xlane.f32.xlu1 %v887_v6  ;;  %v2465_v6 = vand.u32 127, %v485_v3 }
 0x12a   : > { %885 = vadd.xlane.f32.xlu0 %v884_v10 }
 0x12b   : > { %v934_v17 = vadd.s32 4294967288, %v2465_v6  ;;  %v2474_v10 = vsub.s32 %v2465_v6, %v2182_v5  ;;  %vm1419_vm10 = vcmp.lt.s32.totalorder %v2182_v5, %v2465_v6 }
 0x12d   : > { %822 = vadd.xlane.f32.xlu1 %v821_v25  ;;  %v2477_v21 = vsub.s32 %v934_v17, %v2182_v5 }
 0x12e   : > { %819 = vadd.xlane.f32.xlu0 %v818_v30 }
 0x131   : > { %834 = vadd.xlane.f32.xlu1 %v833_v33 }
 0x132   : > { %831 = vadd.xlane.f32.xlu0 %v830_v37 }
 0x135   : > { %840 = vadd.xlane.f32.xlu1 %v839_v40 }
 0x136   : > { %837 = vadd.xlane.f32.xlu0 %v836_v45 }
 0x139   : > { %894 = vadd.xlane.f32.xlu1 %v893_v48 }
 0x13a   : > { %891 = vadd.xlane.f32.xlu0 %v890_v38 }
 0x13d   : > { %846 = vadd.xlane.f32.xlu1 %v845_v52 }
 0x13e   : > { %843 = vadd.xlane.f32.xlu0 %v842_v28 }
 0x154   : > { %1428 = vperm.xlu0 %2002, %v316_v53  }
 0x18e   : > { %v2420_v57 = vpop.xlane.xlu1 %852 }
 0x18f   : > { %v2422_v58 = vpop.xlane.xlu0 %849  ;;  %v1011_v37 = vrot.slane %v2420_v57, %v2477_v21 }
 0x190   : > { %v1007_v41 = vrot.slane %v2422_v58, %v2474_v10 }
 0x192   : > { %v2424_v16 = vpop.xlane.xlu1 %858  ;;  %v1012_v53 = vsel %vm939_vm2, %v1011_v37, %v1007_v41 }
 0x193   : > { %v2426_v51 = vpop.xlane.xlu0 %801  ;;  %v1020_v29 = vrot.slane %v2424_v16, %v2477_v21 }
 0x194   : > { %v933_v30 = vrot.slane %v2426_v51, %v2474_v10 }
 0x196   : > { %v2428_v59 = vpop.xlane.xlu1 %864 }
 0x197   : > { %v2430_v60 = vpop.xlane.xlu0 %804  ;;  %v1029_v32 = vrot.slane %v2428_v59, %v2477_v21 }
 0x198   : > { %v938_v3 = vrot.slane %v2430_v60, %v2477_v21 }
 0x19a   : > { %v2432_v18 = vpop.xlane.xlu1 %876  ;;  %v940_v43 = vsel %vm939_vm2, %v938_v3, %v933_v30 }
 0x19b   : > { %v2434_v22 = vpop.xlane.xlu0 %855 }
 0x19c   : > { %v1016_v25 = vrot.slane %v2434_v22, %v2474_v10 }
 0x19e   : > { %v2436_v27 = vpop.xlane.xlu1 %807  ;;  %v1021_v40 = vsel %vm939_vm2, %v1020_v29, %v1016_v25 }
 0x19f   : > { %v2438_v61 = vpop.xlane.xlu0 %861  ;;  %v944_v33 = vrot.slane %v2436_v27, %v2474_v10 }
 0x1a0   : > { %v1025_v11 = vrot.slane %v2438_v61, %v2474_v10 }
 0x1a2   : > { %v2440_v62 = vpop.xlane.xlu1 %810  ;;  %v1030_v44 = vsel %vm939_vm2, %v1029_v32, %v1025_v11 }
 0x1a3   : > { %v2442_v63 = vpop.xlane.xlu0 %873  ;;  %v948_v26 = vrot.slane %v2440_v62, %v2477_v21 }
 0x1a5   : > { %v949_v39 = vsel %vm939_vm2, %v948_v26, %v944_v33  ;;  %v1090_v26 = vsel %vm1076_vm3, %v1021_v40, %v1012_v53 }
 0x1a6   : > { %v2444_v0 = vpop.xlane.xlu1 %816  ;;  %v1077_v17 = vsel %vm1076_vm3, %v949_v39, %v940_v43  ;;  %v1091_v30 = vsel %vm1078_vm4, %v1030_v44, %v1090_v26 }
 0x1a7   : > { %v2446_v1 = vpop.xlane.xlu0 %813  ;;  %v957_v31 = vrot.slane %v2444_v0, %v2477_v21 }
 0x1a8   : > { %v953_v56 = vrot.slane %v2446_v1, %v2474_v10 }
 0x1aa   : > { %v2448_v2 = vpop.xlane.xlu1 %828  ;;  %v958_v45 = vsel %vm939_vm2, %v957_v31, %v953_v56  ;;  %v1043_v56 = vrot.slane %v2442_v63, %v2474_v10 }
 0x1ab   : > { %v2450_v7 = vpop.xlane.xlu0 %825  ;;  %v975_v46 = vrot.slane %v2448_v2, %v2477_v21  ;;  %v1079_v29 = vsel %vm1078_vm4, %v958_v45, %v1077_v17 }
 0x1ac   : > { %v971_v47 = vrot.slane %v2450_v7, %v2474_v10 }
 0x1ae   : > { %v2452_v9 = vpop.xlane.xlu1 %870  ;;  %v976_v31 = vsel %vm939_vm2, %v975_v46, %v971_v47 }
 0x1af   : > { %v2454_v12 = vpop.xlane.xlu0 %867  ;;  %v1038_v48 = vrot.slane %v2452_v9, %v2477_v21 }
 0x1b0   : > { %v1034_v49 = vrot.slane %v2454_v12, %v2474_v10 }
 0x1b2   : > { %v2456_v4 = vpop.xlane.xlu1 %882  ;;  %v1039_v33 = vsel %vm939_vm2, %v1038_v48, %v1034_v49 }
 0x1b3   : > { %v2458_v13 = vpop.xlane.xlu0 %879 }
 0x1b6   : > { %v2460_v14 = vpop.xlane.xlu1 %888 }
 0x1b7   : > { %v2462_v15 = vpop.xlane.xlu0 %885  ;;  %v1065_v43 = vrot.slane %v2460_v14, %v2477_v21 }
 0x1b8   : > { %v1061_v40 = vrot.slane %v2462_v15, %v2474_v10 }
 0x1ba   : > { %v2468_v19 = vpop.xlane.xlu1 %822  ;;  %v1066_v26 = vsel %vm939_vm2, %v1065_v43, %v1061_v40 }
 0x1bb   : > { %v2470_v20 = vpop.xlane.xlu0 %819  ;;  %v966_v34 = vrot.slane %v2468_v19, %v2477_v21 }
 0x1bc   : > { %v962_v35 = vrot.slane %v2470_v20, %v2474_v10 }
 0x1be   : > { %v2479_v23 = vpop.xlane.xlu1 %834  ;;  %v967_v38 = vsel %vm939_vm2, %v966_v34, %v962_v35  ;;  %v1056_v34 = vrot.slane %v2456_v4, %v2477_v21  ;;  %v1052_v35 = vrot.slane %v2458_v13, %v2474_v10 }
 0x1bf   : > { %v2481_v24 = vpop.xlane.xlu0 %831  ;;  %v984_v50 = vrot.slane %v2479_v23, %v2477_v21  ;;  %v1081_v32 = vsel %vm1080_vm5, %v967_v38, %v1079_v29  ;;  %v1047_v38 = vrot.slane %v2432_v18, %v2477_v21 }
 0x1c0   : > { %v980_v52 = vrot.slane %v2481_v24, %v2474_v10  ;;  %v1083_v49 = vsel %vm1082_vm6, %v976_v31, %v1081_v32  ;;  %v1057_v53 = vsel %vm939_vm2, %v1056_v34, %v1052_v35 }
 0x1c2   : > { %v2507_v36 = vpop.xlane.xlu1 %840  ;;  %v985_v37 = vsel %vm939_vm2, %v984_v50, %v980_v52  ;;  %v1092_v50 = vsel %vm1080_vm5, %v1039_v33, %v1091_v30 }
 0x1c3   : > { %v2513_v42 = vpop.xlane.xlu0 %837  ;;  %v993_v3 = vrot.slane %v2507_v36, %v2477_v21  ;;  %v1085_v52 = vsel %vm1084_vm7, %v985_v37, %v1083_v49 }
 0x1c4   : > { %v989_v25 = vrot.slane %v2513_v42, %v2474_v10 }
 0x1c6   : > { %v2533_v28 = vpop.xlane.xlu1 %894  ;;  %v994_v45 = vsel %vm939_vm2, %v993_v3, %v989_v25  ;;  %v1048_v25 = vsel %vm939_vm2, %v1047_v38, %v1043_v56  ;;  %v1201_v56 = vsub.s32 6, %v2182_v5  ;;  %v1179_v38 = vsub.s32 4, %v2182_v5 }
 0x1c7   : > { %v2541_v11 = vpop.xlane.xlu0 %891  ;;  %v1074_v46 = vrot.slane %v2533_v28, %v2477_v21  ;;  %v1087_v3 = vsel %vm1086_vm8, %v994_v45, %v1085_v52  ;;  %v1093_v30 = vsel %vm1082_vm6, %v1048_v25, %v1092_v50  ;;  %v1157_v52 = vsub.s32 2, %v2182_v5 }
 0x1c8   : > { %v1070_v47 = vrot.slane %v2541_v11, %v2474_v10  ;;  %v1094_v32 = vsel %vm1084_vm7, %v1057_v53, %v1093_v30  ;;  %v1190_v53 = vsub.s32 5, %v2182_v5 }
 0x1c9   : > { %v1095_v33 = vsel %vm1086_vm8, %v1066_v26, %v1094_v32  ;;  %v1168_v26 = vsub.s32 3, %v2182_v5 }
 0x1ca   : > { %v2556_v41 = vpop.xlane.xlu1 %846  ;;  %v1075_v31 = vsel %vm939_vm2, %v1074_v46, %v1070_v47  ;;  %v1146_v47 = vsub.s32 1, %v2182_v5 }
 0x1cb   : > { %v1002_v44 = vrot.slane %v2556_v41, %v2477_v21  ;;  %v2564_v39 = vpop.xlane.xlu0 %843  ;;  %v1096_v34 = vsel %vm1088_vm9, %v1075_v31, %v1095_v33 }
 0x1cc   : > { %v998_v48 = vrot.slane %v2564_v39, %v2474_v10 }
 0x1ce   : > { %v1003_v17 = vsel %vm939_vm2, %v1002_v44, %v998_v48  ;;  %v1212_v44 = vsub.s32 7, %v2182_v5 }
 0x1cf   : > { %v1089_v29 = vsel %vm1088_vm9, %v1003_v17, %v1087_v3 }
 0x1d0   : > { %1099 = vxpose.xlu0.b32.start [1/2] (short) (narrow) %v1089_v29, 16 }
 0x1d3   : > { %v2589_v35 = vpop.permute.xlu0 %1428 }
 0x1d4   : > { %1100 = vxpose.xlu0.b32.end [2/2] (short) (narrow) %v1096_v34, 16 }
 0x250   : > { %v1115_v37 = vpop.trf.xlu0 }
 0x251   : > { %v1202_v43 = vrot.slane %v1115_v37, %v1201_v56  ;;  %v1136_v40 = vrot.slane %v1115_v37, %v2186_v8  ;;  %v1213_v46 = vrot.slane %v1115_v37, %v1212_v44  ;;  %v1147_v49 = vrot.slane %v1115_v37, %v1146_v47 }
 0x252   : > { %v1158_v3 = vrot.slane %v1115_v37, %v1157_v52  ;;  %v1169_v29 = vrot.slane %v1115_v37, %v1168_v26  ;;  %v1180_v31 = vrot.slane %v1115_v37, %v1179_v38  ;;  %v1191_v30 = vrot.slane %v1115_v37, %v1190_v53 }
 0x253   : > { %1204 = vbcast.lane.b32.xlu0 %v1202_v43, 256  ;;  %1138 = vbcast.lane.b32.xlu1 %v1136_v40, 256 }
 0x254   : > { %v1116_v45 = vpop.trf.xlu0 }
 0x255   : > { %v1224_v48 = vrot.slane %v1116_v45, %v2186_v8  ;;  %v1268_v50 = vrot.slane %v1116_v45, %v1179_v38  ;;  %v1279_v17 = vrot.slane %v1116_v45, %v1190_v53  ;;  %v1290_v25 = vrot.slane %v1116_v45, %v1201_v56 }
 0x256   : > { %v1301_v8 = vrot.slane %v1116_v45, %v1212_v44  ;;  %v1235_v32 = vrot.slane %v1116_v45, %v1146_v47  ;;  %v1246_v33 = vrot.slane %v1116_v45, %v1157_v52  ;;  %v1257_v34 = vrot.slane %v1116_v45, %v1168_v26 }
 0x257   : > { %1215 = vbcast.lane.b32.xlu0 %v1213_v46, 256  ;;  %1142 = vbcast.lane.b32.xlu1 %v1136_v40, 264 }
 0x25b   : > { %1149 = vbcast.lane.b32.xlu1 %v1147_v49, 256  ;;  %1226 = vbcast.lane.b32.xlu0 %v1224_v48, 256 }
 0x25f   : > { %1153 = vbcast.lane.b32.xlu1 %v1147_v49, 264  ;;  %1270 = vbcast.lane.b32.xlu0 %v1268_v50, 256 }
 0x263   : > { %1160 = vbcast.lane.b32.xlu1 %v1158_v3, 256  ;;  %1281 = vbcast.lane.b32.xlu0 %v1279_v17, 256 }
 0x267   : > { %1164 = vbcast.lane.b32.xlu1 %v1158_v3, 264  ;;  %1292 = vbcast.lane.b32.xlu0 %v1290_v25, 256 }
 0x26b   : > { %1171 = vbcast.lane.b32.xlu1 %v1169_v29, 256  ;;  %1303 = vbcast.lane.b32.xlu0 %v1301_v8, 256 }
 0x26f   : > { %1175 = vbcast.lane.b32.xlu1 %v1169_v29, 264 }
 0x273   : > { %1182 = vbcast.lane.b32.xlu1 %v1180_v31, 256 }
 0x277   : > { %1186 = vbcast.lane.b32.xlu1 %v1180_v31, 264 }
 0x27b   : > { %1193 = vbcast.lane.b32.xlu1 %v1191_v30, 256 }
 0x27f   : > { %1197 = vbcast.lane.b32.xlu1 %v1191_v30, 264 }
 0x283   : > { %1208 = vbcast.lane.b32.xlu1 %v1202_v43, 264 }
 0x287   : > { %1219 = vbcast.lane.b32.xlu1 %v1213_v46, 264 }
 0x28b   : > { %1230 = vbcast.lane.b32.xlu1 %v1224_v48, 264 }
 0x28f   : > { %1237 = vbcast.lane.b32.xlu1 %v1235_v32, 256 }
 0x293   : > { %1241 = vbcast.lane.b32.xlu1 %v1235_v32, 264 }
 0x297   : > { %1248 = vbcast.lane.b32.xlu1 %v1246_v33, 256 }
 0x29b   : > { %1252 = vbcast.lane.b32.xlu1 %v1246_v33, 264 }
 0x29f   : > { %1259 = vbcast.lane.b32.xlu1 %v1257_v34, 256 }
 0x2a3   : > { %1263 = vbcast.lane.b32.xlu1 %v1257_v34, 264 }
 0x2a7   : > { %1274 = vbcast.lane.b32.xlu1 %v1268_v50, 264 }
 0x2ab   : > { %1285 = vbcast.lane.b32.xlu1 %v1279_v17, 264 }
 0x2af   : > { %1296 = vbcast.lane.b32.xlu1 %v1290_v25, 264 }
 0x2b3   : > { %1307 = vbcast.lane.b32.xlu1 %v1301_v8, 264 }
 0x2c5   : > { %v1139_v56 = vpop.permute.xlu1 %1138 }
 0x2c6   : > { %v1341_v37 = vadd.f32 %v1139_v56, %v2426_v51 }
 0x2c8   : > { %v1384_v43 = vadd.f32 %v2416_v54, %v1341_v37 }
 0x2c9   : > { %v1143_v40 = vpop.permute.xlu1 %1142 }
 0x2ca   : > { %v1443_v44 = vmul.f32 0.5, %v1384_v43  ;;  %v1342_v46 = vadd.f32 %v1143_v40, %v2430_v60 }
 0x2cc   : > { %v1385_v47 = vadd.f32 %v2416_v54, %v1342_v46  ;;  %1508 = vperm.xlu0 %2002, %v1443_v44  }
 0x2cd   : > { %v1150_v48 = vpop.permute.xlu1 %1149 }
 0x2ce   : > { %v1444_v45 = vmul.f32 0.5, %v1385_v47  ;;  %v1343_v49 = vadd.f32 %v1150_v48, %v2436_v27  ;;  %v1205_v47 = vpop.permute.xlu0 %1204 }
 0x2d0   : > { %v1386_v38 = vadd.f32 %v2416_v54, %v1343_v49  ;;  %1511 = vperm.xlu1 %2001, %v1444_v45  }
 0x2d1   : > { %v1154_v50 = vpop.permute.xlu1 %1153 }
 0x2d2   : > { %v1445_v52 = vmul.f32 0.5, %v1386_v38  ;;  %v1344_v51 = vadd.f32 %v1154_v50, %v2440_v62 }
 0x2d4   : > { %v1387_v53 = vadd.f32 %v2416_v54, %v1344_v51  ;;  %1514 = vperm.xlu1 %2001, %v1445_v52  }
 0x2d5   : > { %v1161_v17 = vpop.permute.xlu1 %1160 }
 0x2d6   : > { %v1446_v3 = vmul.f32 0.5, %v1387_v53  ;;  %v1345_v60 = vadd.f32 %v1161_v17, %v2446_v1 }
 0x2d8   : > { %v1388_v25 = vadd.f32 %v2416_v54, %v1345_v60  ;;  %1517 = vperm.xlu0 %2002, %v1446_v3  }
 0x2d9   : > { %v1165_v26 = vpop.permute.xlu1 %1164 }
 0x2da   : > { %v1447_v8 = vmul.f32 0.5, %v1388_v25  ;;  %v1346_v27 = vadd.f32 %v1165_v26, %v2444_v0 }
 0x2dc   : > { %v1389_v29 = vadd.f32 %v2416_v54, %v1346_v27  ;;  %1520 = vperm.xlu1 %2001, %v1447_v8  }
 0x2dd   : > { %v1172_v31 = vpop.permute.xlu1 %1171 }
 0x2de   : > { %v1448_v30 = vmul.f32 0.5, %v1389_v29  ;;  %v1347_v62 = vadd.f32 %v1172_v31, %v2470_v20 }
 0x2e0   : > { %v1390_v32 = vadd.f32 %v2416_v54, %v1347_v62  ;;  %1523 = vperm.xlu0 %2002, %v1448_v30  }
 0x2e1   : > { %v1176_v33 = vpop.permute.xlu1 %1175 }
 0x2e2   : > { %v1449_v34 = vmul.f32 0.5, %v1390_v32  ;;  %v1348_v1 = vadd.f32 %v1176_v33, %v2468_v19  ;;  %v1353_v19 = vadd.f32 %v1205_v47, %v2513_v42 }
 0x2e4   : > { %v1391_v56 = vadd.f32 %v2416_v54, %v1348_v1  ;;  %1526 = vperm.xlu1 %2001, %v1449_v34   ;;  %v1396_v51 = vadd.f32 %v2416_v54, %v1353_v19 }
 0x2e5   : > { %v1183_v37 = vpop.permute.xlu1 %1182 }
 0x2e6   : > { %v1450_v43 = vmul.f32 0.5, %v1391_v56  ;;  %v1349_v0 = vadd.f32 %v1183_v37, %v2450_v7  ;;  %v1216_v7 = vpop.permute.xlu0 %1215  ;;  %v1455_v60 = vmul.f32 0.5, %v1396_v51 }
 0x2e7   : > { %v1355_v42 = vadd.f32 %v1216_v7, %v2564_v39 }
 0x2e8   : > { %v1392_v40 = vadd.f32 %v2416_v54, %v1349_v0  ;;  %1529 = vperm.xlu0 %2002, %v1450_v43  }
 0x2e9   : > { %v1187_v44 = vpop.permute.xlu1 %1186  ;;  %v1398_v29 = vadd.f32 %v2416_v54, %v1355_v42 }
 0x2ea   : > { %v1451_v46 = vmul.f32 0.5, %v1392_v40  ;;  %v1350_v20 = vadd.f32 %v1187_v44, %v2448_v2  ;;  %v1227_v26 = vpop.permute.xlu0 %1226 }
 0x2eb   : > { %v1457_v32 = vmul.f32 0.5, %v1398_v29 }
 0x2ec   : > { %v1393_v48 = vadd.f32 %v2416_v54, %v1350_v20  ;;  %1532 = vperm.xlu1 %2001, %v1451_v46  }
 0x2ed   : > { %v1194_v45 = vpop.permute.xlu1 %1193 }
 0x2ee   : > { %v1452_v49 = vmul.f32 0.5, %v1393_v48  ;;  %v1351_v38 = vadd.f32 %v1194_v45, %v2481_v24  ;;  %v1271_v45 = vpop.permute.xlu0 %1270 }
 0x2f0   : > { %v1394_v50 = vadd.f32 %v2416_v54, %v1351_v38  ;;  %1535 = vperm.xlu0 %2002, %v1452_v49  }
 0x2f1   : > { %v1198_v52 = vpop.permute.xlu1 %1197 }
 0x2f2   : > { %v1453_v53 = vmul.f32 0.5, %v1394_v50  ;;  %v1352_v2 = vadd.f32 %v1198_v52, %v2479_v23  ;;  %v1357_v23 = vadd.f32 %v1227_v26, %v2422_v58  ;;  %v1282_v51 = vpop.permute.xlu0 %1281 }
 0x2f4   : > { %v1395_v17 = vadd.f32 %v2416_v54, %v1352_v2  ;;  %1538 = vperm.xlu1 %2001, %v1453_v53  }
 0x2f5   : > { %v1209_v3 = vpop.permute.xlu1 %1208 }
 0x2f6   : > { %v1454_v25 = vmul.f32 0.5, %v1395_v17  ;;  %v1354_v24 = vadd.f32 %v1209_v3, %v2507_v36  ;;  %v1400_v36 = vadd.f32 %v2416_v54, %v1357_v23  ;;  %v1293_v42 = vpop.permute.xlu0 %1292 }
 0x2f8   : > { %v1397_v8 = vadd.f32 %v2416_v54, %v1354_v24  ;;  %1541 = vperm.xlu0 %2002, %v1454_v25   ;;  %1544 = vperm.xlu1 %2001, %v1455_v60   ;;  %v1459_v37 = vmul.f32 0.5, %v1400_v36  ;;  %v1367_v60 = vadd.f32 %v1282_v51, %v2458_v13 }
 0x2f9   : > { %v1220_v27 = vpop.permute.xlu1 %1219 }
 0x2fa   : > { %v1456_v31 = vmul.f32 0.5, %v1397_v8  ;;  %v1356_v30 = vadd.f32 %v1220_v27, %v2556_v41  ;;  %v1410_v8 = vadd.f32 %v2416_v54, %v1367_v60 }
 0x2fc   : > { %v1399_v62 = vadd.f32 %v2416_v54, %v1356_v30  ;;  %1547 = vperm.xlu0 %2002, %v1456_v31   ;;  %v1304_v31 = vpop.permute.xlu0 %1303  ;;  %v1469_v30 = vmul.f32 0.5, %v1410_v8 }
 0x2fd   : > { %v1231_v39 = vpop.permute.xlu1 %1230 }
 0x2fe   : > { %v1458_v33 = vmul.f32 0.5, %v1399_v62  ;;  %v1358_v34 = vadd.f32 %v1231_v39, %v2420_v57  ;;  %v1371_v39 = vadd.f32 %v1304_v31, %v2541_v11 }
 0x300   : > { %v1401_v1 = vadd.f32 %v2416_v54, %v1358_v34  ;;  %1553 = vperm.xlu1 %2001, %v1458_v33   ;;  %1550 = vperm.xlu0 %2002, %v1457_v32  }
 0x301   : > { %v1238_v56 = vpop.permute.xlu1 %1237 }
 0x302   : > { %v1460_v58 = vmul.f32 0.5, %v1401_v1  ;;  %v1359_v43 = vadd.f32 %v1238_v56, %v2434_v22 }
 0x304   : > { %v1402_v41 = vadd.f32 %v2416_v54, %v1359_v43  ;;  %1559 = vperm.xlu0 %2002, %v1460_v58   ;;  %1556 = vperm.xlu1 %2001, %v1459_v37  }
 0x305   : > { %v1242_v0 = vpop.permute.xlu1 %1241 }
 0x306   : > { %v1461_v40 = vmul.f32 0.5, %v1402_v41  ;;  %v1360_v44 = vadd.f32 %v1242_v0, %v2424_v16  ;;  %v1365_v16 = vadd.f32 %v1271_v45, %v2442_v63 }
 0x308   : > { %v1403_v46 = vadd.f32 %v2416_v54, %v1360_v44  ;;  %1562 = vperm.xlu1 %2001, %v1461_v40   ;;  %v1408_v2 = vadd.f32 %v2416_v54, %v1365_v16 }
 0x309   : > { %v1249_v57 = vpop.permute.xlu1 %1248 }
 0x30a   : > { %v1462_v20 = vmul.f32 0.5, %v1403_v46  ;;  %v1361_v47 = vadd.f32 %v1249_v57, %v2438_v61  ;;  %v1467_v25 = vmul.f32 0.5, %v1408_v2 }
 0x30c   : > { %v1404_v48 = vadd.f32 %v2416_v54, %v1361_v47  ;;  %1565 = vperm.xlu0 %2002, %v1462_v20  }
 0x30d   : > { %v1253_v22 = vpop.permute.xlu1 %1252 }
 0x30e   : > { %v1463_v19 = vmul.f32 0.5, %v1404_v48  ;;  %v1362_v49 = vadd.f32 %v1253_v22, %v2428_v59  ;;  %v2670_v22 = vld [vmem:[%s312_s17] ss:$0 sm:$0xff] }
 0x30f   : > { %v1437_v2 = vmul.f32 %v2670_v22, %v2418_v55 }
 0x310   : > { %v1405_v38 = vadd.f32 %v2416_v54, %v1362_v49  ;;  %1568 = vperm.xlu1 %2001, %v1463_v19  }
 0x311   : > { %v1260_v50 = vpop.permute.xlu1 %1259  ;;  %vm1439_vm11 = vcmp.gt.f32.partialorder %v1437_v2, 0.5 }
 0x312   : > { %v1464_v7 = vmul.f32 0.5, %v1405_v38  ;;  %v1363_v52 = vadd.f32 %v1260_v50, %v2454_v12  ;;  %vm1441_vm12 = vmand %vm1419_vm10, %vm1439_vm11 }
 0x314   : > { %v1406_v61 = vadd.f32 %v2416_v54, %v1363_v52  ;;  %1571 = vperm.xlu0 %2002, %v1464_v7  }
 0x315   : > { %v1264_v53 = vpop.permute.xlu1 %1263 }
 0x316   : > { %v1465_v17 = vmul.f32 0.5, %v1406_v61  ;;  %v1364_v3 = vadd.f32 %v1264_v53, %v2452_v9  ;;  %v1369_v9 = vadd.f32 %v1293_v42, %v2462_v15 }
 0x318   : > { %v1407_v59 = vadd.f32 %v2416_v54, %v1364_v3  ;;  %1574 = vperm.xlu1 %2001, %v1465_v17  }
 0x319   : > { %v1275_v63 = vpop.permute.xlu1 %1274 }
 0x31a   : > { %v1466_v24 = vmul.f32 0.5, %v1407_v59  ;;  %v1366_v12 = vadd.f32 %v1275_v63, %v2432_v18  ;;  %v1412_v18 = vadd.f32 %v2416_v54, %v1369_v9 }
 0x31c   : > { %v1409_v26 = vadd.f32 %v2416_v54, %v1366_v12  ;;  %1577 = vperm.xlu0 %2002, %v1466_v24   ;;  %1580 = vperm.xlu1 %2001, %v1467_v25   ;;  %v1471_v34 = vmul.f32 0.5, %v1412_v18 }
 0x31d   : > { %v1286_v27 = vpop.permute.xlu1 %1285 }
 0x31e   : > { %v1468_v29 = vmul.f32 0.5, %v1409_v26  ;;  %v1368_v23 = vadd.f32 %v1286_v27, %v2456_v4  ;;  %v1414_v4 = vadd.f32 %v2416_v54, %v1371_v39 }
 0x320   : > { %v1411_v13 = vadd.f32 %v2416_v54, %v1368_v23  ;;  %1583 = vperm.xlu0 %2002, %v1468_v29   ;;  %v1473_v11 = vmul.f32 0.5, %v1414_v4 }
 0x321   : > { %v1297_v62 = vpop.permute.xlu1 %1296 }
 0x322   : > { %v1470_v32 = vmul.f32 0.5, %v1411_v13  ;;  %v1370_v36 = vadd.f32 %v1297_v62, %v2460_v14 }
 0x324   : > { %v1413_v33 = vadd.f32 %v2416_v54, %v1370_v36  ;;  %1589 = vperm.xlu1 %2001, %v1470_v32   ;;  %1586 = vperm.xlu0 %2002, %v1469_v30  }
 0x325   : > { %v1308_v15 = vpop.permute.xlu1 %1307 }
 0x326   : > { %v1472_v1 = vmul.f32 0.5, %v1413_v33  ;;  %v1372_v56 = vadd.f32 %v1308_v15, %v2533_v28 }
 0x328   : > { %v1415_v37 = vadd.f32 %v2416_v54, %v1372_v56  ;;  %1595 = vperm.xlu1 %2001, %v1472_v1   ;;  %1592 = vperm.xlu0 %2002, %v1471_v34  }
 0x32a   : > { %v1474_v58 = vmul.f32 0.5, %v1415_v37 }
 0x32c   : > { %1601 = vperm.xlu0 %2002, %v1474_v58   ;;  %1598 = vperm.xlu1 %2001, %v1473_v11  }
 0x34b   : > { %v1509_v43 = vpop.permute.xlu0 %1508 }
 0x34c   : > { %v1606_v7 = vrot.slane %v1509_v43, %v2474_v10 }
 0x34f   : > { %v1512_v14 = vpop.permute.xlu1 %1511 }
 0x350   : > { %v1610_v19 = vrot.slane %v1512_v14, %v2477_v21 }
 0x352   : > { %v1611_v60 = vsel %vm939_vm2, %v1610_v19, %v1606_v7  ;;  %v1438_v7 = vmul.f32 %v2670_v22, %v2589_v35 }
 0x353   : > { %v1515_v41 = vpop.permute.xlu1 %1514 }
 0x354   : > { %v1615_v49 = vrot.slane %v1515_v41, %v2474_v10  ;;  %vm1440_vm15 = vcmp.gt.f32.partialorder %v1438_v7, 0.5 }
 0x357   : > { %v1518_v0 = vpop.permute.xlu0 %1517 }
 0x358   : > { %v1619_v54 = vrot.slane %v1518_v0, %v2477_v21 }
 0x35a   : > { %v1620_v52 = vsel %vm939_vm2, %v1619_v54, %v1615_v49 }
 0x35b   : > { %v1521_v40 = vpop.permute.xlu1 %1520  ;;  %v1747_v24 = vsel %vm1076_vm3, %v1620_v52, %v1611_v60 }
 0x35c   : > { %v1624_v50 = vrot.slane %v1521_v40, %v2474_v10 }
 0x35f   : > { %v1524_v44 = vpop.permute.xlu0 %1523 }
 0x360   : > { %v1628_v48 = vrot.slane %v1524_v44, %v2477_v21 }
 0x362   : > { %v1629_v17 = vsel %vm939_vm2, %v1628_v48, %v1624_v50 }
 0x363   : > { %v1527_v46 = vpop.permute.xlu1 %1526  ;;  %v1748_v55 = vsel %vm1078_vm4, %v1629_v17, %v1747_v24 }
 0x364   : > { %v1633_v51 = vrot.slane %v1527_v46, %v2474_v10 }
 0x367   : > { %v1530_v57 = vpop.permute.xlu0 %1529 }
 0x368   : > { %v1637_v38 = vrot.slane %v1530_v57, %v2477_v21 }
 0x36a   : > { %v1638_v42 = vsel %vm939_vm2, %v1637_v38, %v1633_v51 }
 0x36b   : > { %v1533_v20 = vpop.permute.xlu1 %1532  ;;  %v1749_v27 = vsel %vm1080_vm5, %v1638_v42, %v1748_v55 }
 0x36c   : > { %v1642_v3 = vrot.slane %v1533_v20, %v2474_v10 }
 0x36f   : > { %v1536_v47 = vpop.permute.xlu0 %1535 }
 0x370   : > { %v1646_v16 = vrot.slane %v1536_v47, %v2477_v21 }
 0x372   : > { %v1647_v12 = vsel %vm939_vm2, %v1646_v16, %v1642_v3  ;;  %v1418_v16 = vadd.s32 8, %v2182_v5 }
 0x373   : > { %v1539_v28 = vpop.permute.xlu1 %1538  ;;  %v1750_v31 = vsel %vm1082_vm6, %v1647_v12, %v1749_v27 }
 0x374   : > { %v1651_v63 = vrot.slane %v1539_v28, %v2474_v10  ;;  %vm1420_vm14 = vcmp.lt.s32.totalorder %v1418_v16, %v2465_v6 }
 0x375   : > { %vm1442_vm0 = vmand %vm1420_vm14, %vm1440_vm15 }
 0x377   : > { %v1542_v45 = vpop.permute.xlu0 %1541  ;;  %v1545_v61 = vpop.permute.xlu1 %1544 }
 0x378   : > { %v1655_v53 = vrot.slane %v1542_v45, %v2477_v21  ;;  %v1660_v26 = vrot.slane %v1545_v61, %v2474_v10 }
 0x37a   : > { %v1656_v8 = vsel %vm939_vm2, %v1655_v53, %v1651_v63 }
 0x37b   : > { %v1548_v59 = vpop.permute.xlu0 %1547  ;;  %v1751_v62 = vsel %vm1084_vm7, %v1656_v8, %v1750_v31 }
 0x37c   : > { %v1664_v25 = vrot.slane %v1548_v59, %v2477_v21 }
 0x37e   : > { %v1665_v9 = vsel %vm939_vm2, %v1664_v25, %v1660_v26 }
 0x37f   : > { %v1554_v29 = vpop.permute.xlu1 %1553  ;;  %v1551_v23 = vpop.permute.xlu0 %1550  ;;  %v1752_v18 = vsel %vm1086_vm8, %v1665_v9, %v1751_v62 }
 0x380   : > { %v1673_v13 = vrot.slane %v1554_v29, %v2477_v21  ;;  %v1669_v30 = vrot.slane %v1551_v23, %v2474_v10 }
 0x382   : > { %v1674_v39 = vsel %vm939_vm2, %v1673_v13, %v1669_v30 }
 0x383   : > { %v1753_v32 = vsel %vm1088_vm9, %v1674_v39, %v1752_v18  ;;  %v1557_v15 = vpop.permute.xlu1 %1556  ;;  %v1560_v34 = vpop.permute.xlu0 %1559 }
 0x384   : > { %v1763_v36 = vsel %vm1441_vm12, %v1753_v32, -1e+30  ;;  %v1678_v20 = vrot.slane %v1557_v15, %v2474_v10  ;;  %v1682_v47 = vrot.slane %v1560_v34, %v2477_v21 }
 0x385   : > { %v1765_v33 = vmul.f32 1.442695, %v1763_v36 }
 0x386   : > { %v1683_v2 = vsel %vm939_vm2, %v1682_v47, %v1678_v20 }
 0x387   : > { %2003 = vpow2.f32 %v1765_v33  ;;  %v1563_v1 = vpop.permute.xlu1 %1562 }
 0x388   : > { %v1687_v28 = vrot.slane %v1563_v1, %v2474_v10 }
 0x38b   : > { %v1566_v37 = vpop.permute.xlu0 %1565 }
 0x38c   : > { %v1691_v40 = vrot.slane %v1566_v37, %v2477_v21 }
 0x38e   : > { %v1692_v19 = vsel %vm939_vm2, %v1691_v40, %v1687_v28 }
 0x38f   : > { %v1569_v11 = vpop.permute.xlu1 %1568  ;;  %v1754_v60 = vsel %vm1076_vm3, %v1692_v19, %v1683_v2 }
 0x390   : > { %v1696_v48 = vrot.slane %v1569_v11, %v2474_v10 }
 0x391   : > { %v2705_v4 = vpop.eup %2003 }
 0x392   : > { %v1770_v56 = vsel %vm1769_vm13, %v2705_v4, 0.0 }
 0x393   : > { %1771 = vadd.xlane.f32.xlu1 %v1770_v56  ;;  %v1572_v58 = vpop.permute.xlu0 %1571 }
 0x394   : > { %v1700_v44 = vrot.slane %v1572_v58, %v2477_v21 }
 0x396   : > { %v1701_v52 = vsel %vm939_vm2, %v1700_v44, %v1696_v48 }
 0x397   : > { %v1575_v14 = vpop.permute.xlu1 %1574  ;;  %v1755_v35 = vsel %vm1078_vm4, %v1701_v52, %v1754_v60 }
 0x398   : > { %v1705_v49 = vrot.slane %v1575_v14, %v2474_v10 }
 0x39b   : > { %v1578_v43 = vpop.permute.xlu0 %1577  ;;  %v1581_v41 = vpop.permute.xlu1 %1580 }
 0x39c   : > { %v1709_v54 = vrot.slane %v1578_v43, %v2477_v21  ;;  %v1714_v51 = vrot.slane %v1581_v41, %v2474_v10 }
 0x39e   : > { %v1710_v17 = vsel %vm939_vm2, %v1709_v54, %v1705_v49 }
 0x39f   : > { %v1584_v0 = vpop.permute.xlu0 %1583  ;;  %v1756_v42 = vsel %vm1080_vm5, %v1710_v17, %v1755_v35 }
 0x3a0   : > { %v1718_v45 = vrot.slane %v1584_v0, %v2477_v21 }
 0x3a2   : > { %v1719_v5 = vsel %vm939_vm2, %v1718_v45, %v1714_v51 }
 0x3a3   : > { %v1590_v46 = vpop.permute.xlu1 %1589  ;;  %v1587_v57 = vpop.permute.xlu0 %1586  ;;  %v1757_v12 = vsel %vm1082_vm6, %v1719_v5, %v1756_v42 }
 0x3a4   : > { %v1727_v38 = vrot.slane %v1590_v46, %v2477_v21  ;;  %v1723_v50 = vrot.slane %v1587_v57, %v2474_v10 }
 0x3a6   : > { %v1728_v22 = vsel %vm939_vm2, %v1727_v38, %v1723_v50 }
 0x3a7   : > { %v1596_v61 = vpop.permute.xlu1 %1595  ;;  %v1593_v53 = vpop.permute.xlu0 %1592  ;;  %v1758_v8 = vsel %vm1084_vm7, %v1728_v22, %v1757_v12 }
 0x3a8   : > { %v1736_v3 = vrot.slane %v1596_v61, %v2477_v21  ;;  %v1732_v59 = vrot.slane %v1593_v53, %v2474_v10 }
 0x3aa   : > { %v1737_v63 = vsel %vm939_vm2, %v1736_v3, %v1732_v59 }
 0x3ab   : > { %v1599_v25 = vpop.permute.xlu1 %1598  ;;  %v1602_v24 = vpop.permute.xlu0 %1601  ;;  %v1759_v27 = vsel %vm1086_vm8, %v1737_v63, %v1758_v8 }
 0x3ac   : > { %v1741_v26 = vrot.slane %v1599_v25, %v2474_v10  ;;  %v1745_v55 = vrot.slane %v1602_v24, %v2477_v21 }
 0x3ae   : > { %v1746_v9 = vsel %vm939_vm2, %v1745_v55, %v1741_v26 }
 0x3af   : > { %v1760_v6 = vsel %vm1088_vm9, %v1746_v9, %v1759_v27 }
 0x3b0   : > { %v1764_v29 = vsel %vm1442_vm0, %v1760_v6, -1e+30 }
 0x3b1   : > { %v1767_v23 = vmul.f32 1.442695, %v1764_v29 }
 0x3b3   : > { %2005 = vpow2.f32 %v1767_v23 }
 0x3bd   : > { %v2006_v31 = vpop.eup %2005 }
 0x3be   : > { %v1773_v13 = vsel %vm1769_vm13, %v2006_v31, 0.0 }
 0x3bf   : > { %1774 = vadd.xlane.f32.xlu0 %v1773_v13 }
 0x420   : > { %v1772_v10 = vpop.xlane.xlu1 %1771 }
 0x421   : > { %vm1776_vm1 = vcmp.eq.f32.partialorder %v1772_v10, 0.0 }
 0x422   : > { %v1778_v21 = vsel %vm1776_vm1, 1.0, %v1772_v10 }
 0x423   : > { %2007 = vrcp.f32 %v1778_v21 }
 0x42d   : > { %v2008_v30 = vpop.eup %2007 }
 0x42e   : > { %v1781_v62 = vmul.f32 %v2008_v30, %v2705_v4 }
 0x430   : > { %1784 = vxpose.xlu0.b32.start [1/2] (short) (narrow) %v1781_v62, 16 }
 0x44c   : > { %v1775_v18 = vpop.xlane.xlu0 %1774 }
 0x44d   : > { %vm1777_vm2 = vcmp.eq.f32.partialorder %v1775_v18, 0.0 }
 0x44e   : > { %v1779_v39 = vsel %vm1777_vm2, 1.0, %v1775_v18 }
 0x44f   : > { %2009 = vrcp.f32 %v1779_v39 }
 0x459   : > { %v2010_v32 = vpop.eup %2009 }
 0x45a   : > { %v1783_v36 = vmul.f32 %v2010_v32, %v2006_v31 }
 0x45c   : > { %1785 = vxpose.xlu0.b32.end [2/2] (short) (narrow) %v1783_v36, 16 }
 0x4d8   : > { %v1800_v33 = vpop.trf.xlu0 }
 0x4d9   : > { %v1816_v15 = vadd.f32 %v1800_v33, %v1781_v62 }
 0x4db   : > { %1818 = vst.msk [vmem:[%s299_s20] sm:$0xff] %vm1769_vm13, %v1816_v15 }
 0x4dc   : > { %v1801_v34 = vpop.trf.xlu0 }
 0x4dd   : > { %v1817_v4 = vadd.f32 %v1801_v34, %v1783_v36 }
 0x4df   : > { %1819 = vst.msk [vmem:[%s299_s20 + $0x8] sm:$0xff] %vm1769_vm13, %v1817_v4 }
 0x4e0   : > { %2024 = shalt.err (!%p2021_p3)
}
 0x4e1   : > { %s2025_s15 = scalar_lea.hbm %s2754_s25, 256  ;;  %s2029_s18 = scalar_lea.hbm %s2805_s7, 512 }
 0x4e2   : > { %p2026_p4 = scmp.ne.s32.totalorder %s2754_s25, %s2025_s15  ;;  %p2030_p9 = scmp.lt.u32.totalorder %s2754_s25, %s2805_s7 }
 0x4e3   : > { %p2031_p10 = scmp.lt.u32.totalorder %s2029_s18, %s2025_s15  ;;  %p2033_p12 = scmp.lt.u32.totalorder %s2025_s15, %s2754_s25 }
 0x4e4   : > { %p2027_p7 = pnand %p2026_p4, %p2161_p5 }
 0x4e5   : > { %p2032_p11 = por %p2031_p10, %p2030_p9 }
 0x4e6   : > { %p2028_p8 = pneg %p2027_p7 }
 0x4e7   : > { %p2034_p13 = por %p2033_p12, %p2032_p11 }
 0x4e9   : > { %p2035_p0 = pnand %p2034_p13, %p2028_p8 }
 0x4eb   : > { %2038 = shalt.err (!%p2035_p0)
}
 0x4ec   : > { %s2078_s22 = smov 128   ;;  %s2079_s23 = smov 8  }
 0x4ed   : > { %1957 = dma.vmem_to_hbm [thread:$0]  (%p2161_p5), %s2749_s21, 256, %s2754_s25, %s2757_s30, %s2078_s22, %s2078_s22, %s2079_s23  }
 0x4ee PF: > { %p1963_p1 = scmp.ge.s32.totalorder %s2073_s29, 2  ;;  %s1849_s24 = sand.u32 1, %s2061_s26  }
 0x4ef   : > { %s1850_s9 = scalar_lea.sflag [#allocation4], %s1849_s24 }
 0x4f0   : > { %p1960_p2 = pnand %p1963_p1, %p2165_p6 }
 0x4f2   : > { %2056 = dma.done.wait (!%p1960_p2), %s1850_s9, 256  }
 0x4f3   : > { %2058 = vsyncadd (!%p1960_p2), %s1850_s9, 4294967040  ;;  %p19_p3 = scmp.ge.s32.totalorder %s2148_s8, 4   ;;  %s2808_s26 = smov %s2065_s27 }
 0x4f4   : > { %s2809_s27 = smov %s2069_s28  ;;  %s2810_s28 = smov %s2159_s11 }
 0x4f5   : > { %s2811_s29 = smov %s2148_s8  ;;  %21 = sbr.rel (!%p19_p3) target bundleno = 6 (0x6), region = 89 }
 0x4fc   :  { %1855 = vsyncpa [#allocation4], 1 }
 0x4fd   :  { %1857 = vsyncpa [#allocation4 + $0x1], 1 }

</bundles_post_ra>
